<compile_context>
chip_gen: v7x
topology: tpu7x:2x2x1
jax: 0.10.0
libtpu: 0.0.40
codegen_flags: <defaults>
</compile_context>

<pallas_src>
import math

import jax
import jax.numpy as jnp
from jax.experimental import pallas as pl
from jax.experimental.pallas import tpu as pltpu


_INV_SQRT2 = 1.0 / math.sqrt(2.0)
# Abramowitz & Stegun 7.1.26 erf coefficients (|err| < 1.5e-7); uses only
# exp / mul / add / select, all with guaranteed Mosaic lowerings.
_A1, _A2, _A3, _A4, _A5 = (0.254829592, -0.284496736, 1.421413741,
                           -1.453152027, 1.061405429)
_P = 0.3275911

# ~2 MiB blocks: 2 buffers x (in + out) <= 8 MiB of VMEM -> safe on every
# generation's scoped-VMEM default, while sitting on the flat part of the
# element-wise HBM roofline (>=85% of bandwidth).
_TARGET_BLOCK_BYTES = 2 * 1024 * 1024


def _gelu_kernel(x_ref, o_ref):
    # Exact erf-gelu with the sign handling folded into the final select:
    #   z = |x|/sqrt(2), t = 1/(1 + p*z), q = poly(t) * exp(-z*z)
    #   gelu(x) = x * (1 - 0.5*q)  if x >= 0
    #           = x * (0.5*q)      if x <  0
    # exp and the reciprocal land in the EUP slot; the rest is VPU work.
    x = x_ref[...].astype(jnp.float32)
    z = jnp.abs(x) * _INV_SQRT2
    t = pl.reciprocal(1.0 + _P * z, approx=False)
    poly = t * (_A1 + t * (_A2 + t * (_A3 + t * (_A4 + t * _A5))))
    q = poly * jnp.exp(-(z * z))
    half = jnp.where(x >= 0.0, 1.0 - 0.5 * q, 0.5 * q)
    o_ref[...] = (x * half).astype(o_ref.dtype)


def _relu_kernel(x_ref, o_ref):
    o_ref[...] = jnp.maximum(x_ref[...], 0)


def _round_up(v, m):
    return -(-v // m) * m


def _jnp_activate(x, activate_fun):
    """Plain-jnp fallback for tiny tails / sub-128-element inputs (exact)."""
    if activate_fun == "relu":
        return jnp.maximum(x, 0)
    return x * 0.5 * (1.0 + jax.scipy.special.erf(x * _INV_SQRT2))


def pallas_activate(x, activate_fun="gelu"):
    """Element-wise activation matching ActivateFun.forward (relu / exact gelu)."""
    if activate_fun not in ("relu", "gelu"):
        raise ValueError(f"unsupported activate_fun: {activate_fun!r}")

    orig_shape = x.shape
    n = x.size
    if n == 0:
        return x
    if n < 128:
        # Smaller than one lane row: a kernel launch is pure overhead.
        return _jnp_activate(x, activate_fun)

    # 128-aligned bulk goes through the kernel; a (<cols)-element tail, if any,
    # is handled with plain jnp instead of padding + slicing the whole array.
    n_main = (n // 128) * 128
    flat = x.reshape(-1)
    main = flat if n_main == n else flat[:n_main]

    # Lane-dense 2-D layout: widest divisor of the bulk among {512, 256, 128}
    # so output stores are full-width (unmasked) vst.
    if n_main % 512 == 0:
        cols = 512
    elif n_main % 256 == 0:
        cols = 256
    else:
        cols = 128
    rows = n_main // cols
    x2 = main.reshape(rows, cols)

    # Byte-budget row tile, 8-sublane granular, then re-balanced so all grid
    # steps are near-equal (even split across v7x's two TensorCores).
    itemsize = jnp.dtype(x.dtype).itemsize
    tm = min(rows, max(8, (_TARGET_BLOCK_BYTES // (cols * itemsize)) // 8 * 8))
    nblocks = pl.cdiv(rows, tm)
    if 1 < nblocks <= 3:
        nblocks = 2
    if nblocks > 1:
        tm = min(rows, _round_up(pl.cdiv(rows, nblocks), 8))
    grid = (pl.cdiv(rows, tm),)

    kernel = _relu_kernel if activate_fun == "relu" else _gelu_kernel
    cost = pl.CostEstimate(
        flops=(1 if activate_fun == "relu" else 21) * n_main,
        transcendentals=(0 if activate_fun == "relu" else 2 * n_main),
        bytes_accessed=2 * n_main * itemsize,
    )

    out2 = pl.pallas_call(
        kernel,
        out_shape=jax.ShapeDtypeStruct((rows, cols), x.dtype),
        grid_spec=pltpu.PrefetchScalarGridSpec(
            num_scalar_prefetch=0,
            grid=grid,
            in_specs=[pl.BlockSpec((tm, cols), lambda i: (i, 0))],
            out_specs=pl.BlockSpec((tm, cols), lambda i: (i, 0)),
        ),
        compiler_params=pltpu.CompilerParams(
            dimension_semantics=("parallel",),  # megacore-shardable on v7x
        ),
        cost_estimate=cost,
    )(x2)

    out_flat = out2.reshape(-1)
    if n_main != n:
        tail = _jnp_activate(flat[n_main:], activate_fun)
        out_flat = jnp.concatenate([out_flat, tail])
    return out_flat.reshape(orig_shape)


class ActivateFun:
    """Mirror of the PyTorch module: opt.activate_fun in {'relu', 'gelu'}."""

    def __init__(self, activate_fun):
        self.activate_fun = activate_fun

    def __call__(self, x):
        return pallas_activate(x, self.activate_fun)


if __name__ == "__main__":
    key = jax.random.PRNGKey(0)
    k1, k2 = jax.random.split(key)
    # Aligned case (n = 512, single lane-dense block) and a ragged case
    # (n = 777 -> 768-element bulk through the kernel + 9-element jnp tail).
    xs = [
        jax.random.normal(k1, (2, 8, 32), jnp.float32),
        jax.random.normal(k2, (3, 7, 37), jnp.float32),
    ]

    gelu_mod = ActivateFun("gelu")
    relu_mod = ActivateFun("relu")

    for x in xs:
        y_gelu = jax.block_until_ready(gelu_mod(x))
        y_relu = jax.block_until_ready(relu_mod(x))

        # References (exact erf-gelu, matching the PyTorch module's formula).
        ref_gelu = x * 0.5 * (1.0 + jax.scipy.special.erf(x / jnp.sqrt(2.0)))
        ref_relu = jnp.maximum(x, 0.0)

        assert y_gelu.shape == x.shape
        assert y_relu.shape == x.shape
        assert jnp.allclose(y_gelu, ref_gelu, atol=1e-5, rtol=1e-5)
        assert jnp.allclose(y_relu, ref_relu, atol=1e-5, rtol=1e-5)

    print("KERNEL_OK")
</pallas_src>

<mosaic_0001>
module attributes {stable_mosaic.version = 11 : i64} {
  func.func @_gelu_kernel(%arg0: i32, %arg1: memref<1x512xf32, #tpu.memory_space<vmem>>, %arg2: memref<1x512xf32, #tpu.memory_space<vmem>>) attributes {dimension_semantics = [#tpu.dimension_semantics<parallel>], iteration_bounds = array<i64: 1>, scalar_prefetch = 0 : i64, scratch_operands = 0 : i64, tpu.core_type = #tpu.core_type<tc>, window_params = [{transform_indices = @transform_0, window_bounds = array<i64: 1, 512>}, {transform_indices = @transform_1, window_bounds = array<i64: 1, 512>}]} {
    %c0 = arith.constant 0 : index
    %c0_0 = arith.constant 0 : index
    %0 = vector.load %arg1[%c0, %c0_0] : memref<1x512xf32, #tpu.memory_space<vmem>>, vector<1x512xf32>
    %1 = math.absf %0 : vector<1x512xf32>
    %cst = arith.constant 0.707106769 : f32
    %2 = vector.broadcast %cst : f32 to vector<1x512xf32>
    %3 = arith.mulf %1, %2 : vector<1x512xf32>
    %cst_1 = arith.constant 0.327591091 : f32
    %4 = vector.broadcast %cst_1 : f32 to vector<1x512xf32>
    %5 = arith.mulf %4, %3 : vector<1x512xf32>
    %cst_2 = arith.constant 1.000000e+00 : f32
    %6 = vector.broadcast %cst_2 : f32 to vector<1x512xf32>
    %7 = arith.addf %6, %5 : vector<1x512xf32>
    %8 = tpu.reciprocal %7 : vector<1x512xf32> -> vector<1x512xf32>
    %cst_3 = arith.constant 1.06140542 : f32
    %9 = vector.broadcast %cst_3 : f32 to vector<1x512xf32>
    %10 = arith.mulf %8, %9 : vector<1x512xf32>
    %cst_4 = arith.constant -1.45315206 : f32
    %11 = vector.broadcast %cst_4 : f32 to vector<1x512xf32>
    %12 = arith.addf %11, %10 : vector<1x512xf32>
    %13 = arith.mulf %8, %12 : vector<1x512xf32>
    %cst_5 = arith.constant 1.42141378 : f32
    %14 = vector.broadcast %cst_5 : f32 to vector<1x512xf32>
    %15 = arith.addf %14, %13 : vector<1x512xf32>
    %16 = arith.mulf %8, %15 : vector<1x512xf32>
    %cst_6 = arith.constant -0.284496725 : f32
    %17 = vector.broadcast %cst_6 : f32 to vector<1x512xf32>
    %18 = arith.addf %17, %16 : vector<1x512xf32>
    %19 = arith.mulf %8, %18 : vector<1x512xf32>
    %cst_7 = arith.constant 0.254829586 : f32
    %20 = vector.broadcast %cst_7 : f32 to vector<1x512xf32>
    %21 = arith.addf %20, %19 : vector<1x512xf32>
    %22 = arith.mulf %8, %21 : vector<1x512xf32>
    %23 = arith.mulf %3, %3 : vector<1x512xf32>
    %cst_8 = arith.constant 0.000000e+00 : f32
    %24 = vector.broadcast %cst_8 : f32 to vector<1x512xf32>
    %25 = arith.subf %24, %23 : vector<1x512xf32>
    %26 = math.exp %25 : vector<1x512xf32>
    %27 = arith.mulf %22, %26 : vector<1x512xf32>
    %cst_9 = arith.constant 0.000000e+00 : f32
    %28 = vector.broadcast %cst_9 : f32 to vector<1x512xf32>
    %29 = arith.cmpf oge, %0, %28 : vector<1x512xf32>
    %cst_10 = arith.constant 5.000000e-01 : f32
    %30 = vector.broadcast %cst_10 : f32 to vector<1x512xf32>
    %31 = arith.mulf %30, %27 : vector<1x512xf32>
    %cst_11 = arith.constant 1.000000e+00 : f32
    %32 = vector.broadcast %cst_11 : f32 to vector<1x512xf32>
    %33 = arith.subf %32, %31 : vector<1x512xf32>
    %cst_12 = arith.constant 5.000000e-01 : f32
    %34 = vector.broadcast %cst_12 : f32 to vector<1x512xf32>
    %35 = arith.mulf %34, %27 : vector<1x512xf32>
    %36 = arith.select %29, %33, %35 : vector<1x512xi1>, vector<1x512xf32>
    %37 = arith.mulf %0, %36 : vector<1x512xf32>
    %c0_13 = arith.constant 0 : index
    %c0_14 = arith.constant 0 : index
    %38 = vector.load %arg2[%c0_13, %c0_14] : memref<1x512xf32, #tpu.memory_space<vmem>>, vector<1x512xf32>
    tpu.vector_store %arg2[%c0_13, %c0_14], %37 {strides = array<i32>} : memref<1x512xf32, #tpu.memory_space<vmem>>, vector<1x512xf32>,
    return
  }
  func.func @transform_0(%arg0: i32) -> (i32, i32) {
    %c0_i32 = arith.constant 0 : i32
    %c0_i32_0 = arith.constant 0 : i32
    return %arg0, %c0_i32 : i32, i32
  }
  func.func @transform_1(%arg0: i32) -> (i32, i32) {
    %c0_i32 = arith.constant 0 : i32
    %c0_i32_0 = arith.constant 0 : i32
    return %arg0, %c0_i32 : i32, i32
  }
}

</mosaic_0001>

<bundles_post_ra>
// kernel: tpu_custom_call.1
= control target key start
LH: loop header
LB: loop body
LE: loop exit
PB: predicated region body
PF: predicated region fallthrough
CT: control target
= control target key end

     0   :  { %6 = vsyncpa [#allocation3], 0  ;;  %s156_s0 = inlined_call_operand.hbm [shape: f32[1,512], index: 0, kind: input, shape index: {}]   ;;  %s157_s1 = inlined_call_operand.hbm [shape: f32[1,512], index: 1, kind: output, shape index: {}]  }
   0x1   :  { %7 = vsyncpa [#allocation4], 0  ;;  %s120_s6 = smov [#allocation2]   ;;  %s72_s10 = scalar_lea.hbm %s156_s0, 64 }
   0x2   :  { %s14_s7 = sshll.u32 %s120_s6, 4  ;;  %p73_p0 = scmp.ne.s32.totalorder %s156_s0, %s72_s10  ;;  %s15_s7 = int_to_ptr.vmem [resolvable:$true] %s14_s7 }
   0x3   :  { %p76_p1 = scmp.lt.u32.totalorder %s72_s10, %s156_s0 }
   0x5   :  { %p78_p2 = pnand %p76_p1, %p73_p0 }
   0x7   :  { %81 = shalt.err (!%p78_p2)
}
   0x8   :  { %s82_s15 = scalar_lea.vmem %s15_s7, 64  ;;  %p87_p4 = scmp.lt.s32.totalorder %s15_s7, %s15_s7 }
   0x9   :  { %p83_p3 = scmp.ne.s32.totalorder %s15_s7, %s82_s15  ;;  %p88_p5 = scmp.lt.s32.totalorder %s82_s15, %s82_s15 }
   0xb   :  { %p89_p6 = por %p88_p5, %p87_p4 }
   0xd   :  { %p90_p7 = pnand %p89_p6, %p83_p3 }
   0xf   :  { %93 = shalt.err (!%p90_p7)
}
  0x10   :  { %17 = dma.hbm_to_vmem [thread:$0]  %s156_s0, 64, %s15_s7, [#allocation3]  }
  0x11   :  { %116 = dma.done.wait [#allocation3], 64  }
  0x12   :  { %117 = vsyncadd [#allocation3], 4294967232  ;;  %v21_v0 = vld [vmem:[#allocation2] sm:$0xf]  ;;  %v46_v21 = vlaneseq  ;;  %s121_s0 = smov [#allocation5]  }
  0x13   :  { %v22_v1 = vand.u32 2147483647, %v21_v0  ;;  %vm41_vm0 = vcmp.ge.f32.partialorder %v21_v0, 0.0  ;;  %s57_s18 = sshll.u32 %s121_s0, 4  ;;  %s58_s18 = int_to_ptr.vmem [resolvable:$true] %s57_s18 }
  0x14   :  { %vm48_vm1 = vcmp.lt.s32.totalorder %v46_v21, 512  ;;  %s94_s19 = scalar_lea.vmem %s58_s18, 64  ;;  %p99_p9 = scmp.lt.s32.totalorder %s58_s18, %s58_s18 }
  0x15   :  { %v23_v2 = vmul.f32 0.70710677, %v22_v1  ;;  %p95_p8 = scmp.ne.s32.totalorder %s58_s18, %s94_s19  ;;  %p100_p10 = scmp.lt.s32.totalorder %s94_s19, %s94_s19 }
  0x17   :  { %v24_v3 = vmul.f32 0.3275911, %v23_v2  ;;  %v36_v5 = vmul.f32 %v23_v2, %v23_v2  ;;  %p101_p11 = por %p100_p10, %p99_p9 }
  0x19   :  { %v25_v4 = vadd.f32 1.0, %v24_v3  ;;  %v37_v6 = vsub.f32 0.0, %v36_v5  ;;  %p102_p12 = pnand %p101_p11, %p95_p8 }
  0x1b   :  { %68 = vrcp.f32 %v25_v4  ;;  %v38_v9 = vmul.f32 1.442695, %v37_v6 }
  0x1d   :  { %70 = vpow2.f32 %v38_v9 }
  0x25   :  { %v69_v7 = vpop.eup %68 }
  0x26   :  { %v27_v8 = vmul.f32 1.0614054, %v69_v7 }
  0x27   :  { %v71_v17 = vpop.eup %70 }
  0x28   :  { %v28_v10 = vadd.f32 -1.4531521, %v27_v8 }
  0x2a   :  { %v29_v11 = vmul.f32 %v69_v7, %v28_v10 }
  0x2c   :  { %v30_v12 = vadd.f32 1.4214138, %v29_v11 }
  0x2e   :  { %v31_v13 = vmul.f32 %v69_v7, %v30_v12 }
  0x30   :  { %v32_v14 = vadd.f32 -0.28449672, %v31_v13 }
  0x32   :  { %v33_v15 = vmul.f32 %v69_v7, %v32_v14 }
  0x34   :  { %v34_v16 = vadd.f32 0.2548296, %v33_v15 }
  0x36   :  { %v35_v18 = vmul.f32 %v69_v7, %v34_v16 }
  0x38   :  { %v40_v19 = vmul.f32 %v71_v17, %v35_v18 }
  0x3a   :  { %v42_v20 = vmul.f32 0.5, %v40_v19 }
  0x3c   :  { %v43_v22 = vsub.f32 1.0, %v42_v20 }
  0x3e   :  { %v44_v23 = vsel %vm41_vm0, %v43_v22, %v42_v20 }
  0x3f   :  { %v45_v24 = vmul.f32 %v44_v23, %v21_v0 }
  0x41   :  { %50 = vst.msk [vmem:[#allocation5] sm:$0xf] %vm48_vm1, %v45_v24 }
  0x42   :  { %105 = shalt.err (!%p102_p12)
}
  0x43   :  { %s106_s22 = scalar_lea.hbm %s157_s1, 64 }
  0x44   :  { %p107_p13 = scmp.ne.s32.totalorder %s157_s1, %s106_s22  ;;  %p110_p0 = scmp.lt.u32.totalorder %s106_s22, %s157_s1 }
  0x46   :  { %p112_p1 = pnand %p110_p0, %p107_p13 }
  0x48   :  { %115 = shalt.err (!%p112_p1)
}
  0x49   :  { %60 = dma.vmem_to_hbm [thread:$0]  %s58_s18, 64, %s157_s1, [#allocation4]  }
  0x4a   :  { %118 = dma.done.wait [#allocation4], 64  }
  0x4b   :  { %119 = vsyncadd [#allocation4], 4294967232 }
  0x4c   :  { %64 = vsyncpa [#allocation3], 1 }
  0x4d   :  { %65 = vsyncpa [#allocation4], 1 }

</bundles_post_ra>
